<compile_context>
chip_gen: v7x
topology: tpu7x:2x2x1
jax: 0.10.0
libtpu: 0.0.40
codegen_flags: <defaults>
</compile_context>

<pallas_src>
import math
from functools import partial

import jax
import jax.numpy as jnp
from jax import lax
from jax.experimental import pallas as pl
from jax.experimental.pallas import tpu as pltpu


def _round_up(x, m):
    return (x + m - 1) // m * m


def _cdiv(a, b):
    return -(-a // b)


def _mmd_kernel(x_ref, w_ref, wm_ref, b_ref, o_ref, acc_ref,
                *, in_features, tk, mask_k_tail):
    # Refs (task dim squeezed):
    #   x_ref: (tb, tk)   w_ref/wm_ref: (tk, tn)   b_ref: (1, tn)
    #   o_ref: (tb, tn)   acc_ref: (tb, tn) f32 scratch
    k = pl.program_id(3)

    @pl.when(k == 0)
    def _():
        acc_ref[...] = jnp.zeros_like(acc_ref)

    x = x_ref[...]
    # Mask multiply; mask may be int8 {0,1} (exact) or the weight dtype.
    w = w_ref[...] * wm_ref[...].astype(w_ref.dtype)

    if mask_k_tail:
        # IN is not a multiple of tk: the last K block's out-of-bounds region
        # holds unspecified data.  Zero BOTH operands' tails so every tail
        # product is exactly 0 (guards against stale NaN/Inf garbage).
        k_base = k * tk
        col_ids = k_base + lax.broadcasted_iota(jnp.int32, x.shape, 1)
        x = jnp.where(col_ids < in_features, x, 0)
        row_ids = k_base + lax.broadcasted_iota(jnp.int32, w.shape, 0)
        w = jnp.where(row_ids < in_features, w, 0)

    acc_ref[...] += jnp.dot(x, w, preferred_element_type=jnp.float32)

    @pl.when(k == pl.num_programs(3) - 1)
    def _():
        o_ref[...] = (acc_ref[...] + b_ref[...].astype(jnp.float32)).astype(o_ref.dtype)


def prepare_w_mask(w_mask):
    """One-time conversion of a {0,1} weight mask to int8.

    Call this at prune/build time, NOT per forward call: the forward then
    streams 1 B/elem of mask with no extra per-call cast pass over HBM.
    (Exact only for {0,1} masks, which is what prune() produces.)
    """
    return w_mask.astype(jnp.int8)


def multi_masked_dense(x, w, w_mask, b, b_mask, *, tk=1024, tn=1024, tb=512):
    """MultiMaskedDense forward.

    x: (T, B, IN); w: (T, IN, OUT); w_mask: (T, IN, OUT) int8/float {0,1};
    b/b_mask: (T, OUT).  Returns stacked (T, B, OUT); out[i] equals the i-th
    element of the PyTorch module's returned list.
    """
    T, B, IN = x.shape
    OUT = w.shape[-1]
    out_dtype = x.dtype

    # bool VMEM blocks are awkward on TPU; normalize (no-op for int8/float).
    if w_mask.dtype == jnp.bool_:
        w_mask = w_mask.astype(jnp.int8)

    # Fold the (tiny) bias mask on the wrapper side; one fewer input stream.
    bias = (b * b_mask).astype(jnp.float32).reshape(T, 1, OUT)

    # Tile selection: full-extent block when the dim fits, otherwise an aligned
    # tile with a cdiv grid (tails handled in-kernel / by dropped OOB stores).
    def pick(dim, target):
        if dim <= target:
            return dim, 1
        return target, _cdiv(dim, target)

    tb_, nb_b = pick(B, tb)
    tk_, nb_k = pick(IN, tk)
    tn_, nb_n = pick(OUT, tn)

    # Keep >=2 parallel tiles so v7x megacore has work for both TensorCores.
    if T * nb_b * nb_n < 2:
        if OUT >= 256:
            tn_ = _round_up(_cdiv(OUT, 2), 128)
            nb_n = _cdiv(OUT, tn_)
        elif B >= 16:
            tb_ = _round_up(_cdiv(B, 2), 8)
            nb_b = _cdiv(B, tb_)

    mask_k_tail = (tk_ * nb_k != IN)

    grid = (T, nb_b, nb_n, nb_k)
    kernel = partial(_mmd_kernel, in_features=IN, tk=tk_, mask_k_tail=mask_k_tail)

    bytes_accessed = int(
        x.size * x.dtype.itemsize
        + w.size * w.dtype.itemsize
        + w_mask.size * w_mask.dtype.itemsize
        + bias.size * bias.dtype.itemsize
        + T * B * OUT * jnp.dtype(out_dtype).itemsize
    )

    out = pl.pallas_call(
        kernel,
        out_shape=jax.ShapeDtypeStruct((T, B, OUT), out_dtype),
        grid_spec=pltpu.PrefetchScalarGridSpec(
            num_scalar_prefetch=0,
            grid=grid,
            in_specs=[
                pl.BlockSpec((None, tb_, tk_), lambda t, bi, n, k: (t, bi, k)),  # x
                pl.BlockSpec((None, tk_, tn_), lambda t, bi, n, k: (t, k, n)),   # w
                pl.BlockSpec((None, tk_, tn_), lambda t, bi, n, k: (t, k, n)),   # w_mask
                pl.BlockSpec((None, 1, tn_), lambda t, bi, n, k: (t, 0, n)),     # pre-masked bias
            ],
            out_specs=pl.BlockSpec((None, tb_, tn_), lambda t, bi, n, k: (t, bi, n)),
            scratch_shapes=[pltpu.VMEM((tb_, tn_), jnp.float32)],
        ),
        compiler_params=pltpu.CompilerParams(
            dimension_semantics=("parallel", "parallel", "parallel", "arbitrary"),
            vmem_limit_bytes=32 * 1024 * 1024,
        ),
        cost_estimate=pl.CostEstimate(
            flops=2 * T * B * IN * OUT,
            transcendentals=0,
            bytes_accessed=bytes_accessed,
        ),
    )(x, w, w_mask, bias)

    return out


def init_params(key, num_tasks, in_features, out_features):
    """Deterministic param init mimicking torch kaiming_normal_(a=sqrt(5))."""
    gain = math.sqrt(2.0 / (1.0 + 5.0))
    fan_in = in_features * out_features           # torch fan_in on a 3-D tensor
    std = gain / math.sqrt(fan_in)
    w = std * jax.random.normal(
        key, (num_tasks, in_features, out_features), dtype=jnp.float32
    )
    b = jnp.zeros((num_tasks, out_features), dtype=jnp.float32)
    return w, b


if __name__ == "__main__":
    # --- Small demo consistent with the module (3 tasks, batch 8, 32 -> 32) ---
    num_tasks, batch, in_features, out_features = 3, 8, 32, 32

    key = jax.random.PRNGKey(0)
    kx, kw, kwm, kbm = jax.random.split(key, 4)

    x = jax.random.normal(kx, (num_tasks, batch, in_features), dtype=jnp.float32)
    w, b = init_params(kw, num_tasks, in_features, out_features)
    b = b + 0.1  # non-zero bias so the bias path is actually exercised

    # {0,1} masks as produced by prune(); w_mask is converted to int8 ONCE here,
    # outside the forward (per the perf review), so the hot path streams 1 B/elem.
    w_mask_f = (
        jax.random.uniform(kwm, (num_tasks, in_features, out_features)) > 0.3
    ).astype(jnp.float32)
    b_mask = (
        jax.random.uniform(kbm, (num_tasks, out_features)) > 0.3
    ).astype(jnp.float32)
    w_mask = prepare_w_mask(w_mask_f)

    out = multi_masked_dense(x, w, w_mask, b, b_mask)
    out = jax.block_until_ready(out)

    ref = (
        jnp.einsum("tbi,tio->tbo", x, w * w_mask_f,
                   precision=jax.lax.Precision.HIGHEST)
        + (b * b_mask)[:, None, :]
    )
    assert out.shape == (num_tasks, batch, out_features)
    assert jnp.allclose(out, ref, atol=1e-5, rtol=1e-5), float(jnp.max(jnp.abs(out - ref)))

    # --- Second small check exercising the tiled / tail paths (unaligned dims) ---
    T2, B2, IN2, OUT2 = 1, 20, 200, 300
    k2 = jax.random.split(jax.random.PRNGKey(1), 4)
    x2 = jax.random.normal(k2[0], (T2, B2, IN2), dtype=jnp.float32)
    w2, b2 = init_params(k2[1], T2, IN2, OUT2)
    b2 = b2 + 0.05
    wm2_f = (jax.random.uniform(k2[2], (T2, IN2, OUT2)) > 0.5).astype(jnp.float32)
    bm2 = (jax.random.uniform(k2[3], (T2, OUT2)) > 0.5).astype(jnp.float32)

    out2 = multi_masked_dense(x2, w2, prepare_w_mask(wm2_f), b2, bm2,
                              tk=128, tn=128, tb=8)
    out2 = jax.block_until_ready(out2)
    ref2 = (
        jnp.einsum("tbi,tio->tbo", x2, w2 * wm2_f,
                   precision=jax.lax.Precision.HIGHEST)
        + (b2 * bm2)[:, None, :]
    )
    assert out2.shape == (T2, B2, OUT2)
    assert jnp.allclose(out2, ref2, atol=1e-5, rtol=1e-5), float(jnp.max(jnp.abs(out2 - ref2)))

    print("KERNEL_OK")
</pallas_src>

<mosaic_0001>
module attributes {stable_mosaic.version = 11 : i64} {
  func.func @_mmd_kernel(%arg0: i32, %arg1: i32, %arg2: i32, %arg3: i32, %arg4: memref<1x8x32xf32, #tpu.memory_space<vmem>>, %arg5: memref<1x32x32xf32, #tpu.memory_space<vmem>>, %arg6: memref<1x32x32xi8, #tpu.memory_space<vmem>>, %arg7: memref<1x1x32xf32, #tpu.memory_space<vmem>>, %arg8: memref<1x8x32xf32, #tpu.memory_space<vmem>>, %arg9: memref<8x32xf32, #tpu.memory_space<vmem>>) attributes {dimension_semantics = [#tpu.dimension_semantics<parallel>, #tpu.dimension_semantics<parallel>, #tpu.dimension_semantics<parallel>, #tpu.dimension_semantics<arbitrary>], iteration_bounds = array<i64: 3, 1, 1, 1>, scalar_prefetch = 0 : i64, scratch_operands = 1 : i64, tpu.core_type = #tpu.core_type<tc>, window_params = [{transform_indices = @transform_0, window_bounds = array<i64: 1, 8, 32>}, {transform_indices = @transform_1, window_bounds = array<i64: 1, 32, 32>}, {transform_indices = @transform_2, window_bounds = array<i64: 1, 32, 32>}, {transform_indices = @transform_3, window_bounds = array<i64: 1, 1, 32>}, {transform_indices = @transform_4, window_bounds = array<i64: 1, 8, 32>}]} {
    %c0_i32 = arith.constant 0 : i32
    %0 = arith.cmpi eq, %arg3, %c0_i32 : i32
    %1 = arith.extui %0 : i1 to i32
    %c0_i32_0 = arith.constant 0 : i32
    %2 = arith.cmpi ne, %1, %c0_i32_0 : i32
    scf.if %2 {
      %cst_15 = arith.constant 0.000000e+00 : f32
      %18 = vector.broadcast %cst_15 : f32 to vector<8x32xf32>
      %c0_16 = arith.constant 0 : index
      %c0_17 = arith.constant 0 : index
      %19 = vector.load %arg9[%c0_16, %c0_17] : memref<8x32xf32, #tpu.memory_space<vmem>>, vector<8x32xf32>
      tpu.vector_store %arg9[%c0_16, %c0_17], %18 {strides = array<i32>} : memref<8x32xf32, #tpu.memory_space<vmem>>, vector<8x32xf32>,
    } else {
    }
    %c0 = arith.constant 0 : index
    %c0_1 = arith.constant 0 : index
    %c0_2 = arith.constant 0 : index
    %3 = vector.load %arg4[%c0, %c0_1, %c0_2] : memref<1x8x32xf32, #tpu.memory_space<vmem>>, vector<1x8x32xf32>
    %4 = vector.shape_cast %3 : vector<1x8x32xf32> to vector<8x32xf32>
    %c0_3 = arith.constant 0 : index
    %c0_4 = arith.constant 0 : index
    %c0_5 = arith.constant 0 : index
    %5 = vector.load %arg5[%c0_3, %c0_4, %c0_5] : memref<1x32x32xf32, #tpu.memory_space<vmem>>, vector<1x32x32xf32>
    %6 = vector.shape_cast %5 : vector<1x32x32xf32> to vector<32x32xf32>
    %c0_6 = arith.constant 0 : index
    %c0_7 = arith.constant 0 : index
    %c0_8 = arith.constant 0 : index
    %7 = vector.load %arg6[%c0_6, %c0_7, %c0_8] : memref<1x32x32xi8, #tpu.memory_space<vmem>>, vector<1x32x32xi8>
    %8 = vector.shape_cast %7 : vector<1x32x32xi8> to vector<32x32xi8>
    %9 = arith.sitofp %8 : vector<32x32xi8> to vector<32x32xf32>
    %10 = arith.mulf %6, %9 : vector<32x32xf32>
    %c0_9 = arith.constant 0 : index
    %c0_10 = arith.constant 0 : index
    %11 = vector.load %arg9[%c0_9, %c0_10] : memref<8x32xf32, #tpu.memory_space<vmem>>, vector<8x32xf32>
    %cst = arith.constant dense<0.000000e+00> : vector<8x32xf32>
    %12 = tpu.matmul %4, %10, %cst {dimension_numbers = #tpu.dot_dimension_numbers<[1], [0], [0], [1], [0, 0, 1, 1], [], []>} : vector<8x32xf32>, vector<32x32xf32>, vector<8x32xf32> -> vector<8x32xf32>
    %13 = arith.addf %11, %12 : vector<8x32xf32>
    %c0_11 = arith.constant 0 : index
    %c0_12 = arith.constant 0 : index
    %14 = vector.load %arg9[%c0_11, %c0_12] : memref<8x32xf32, #tpu.memory_space<vmem>>, vector<8x32xf32>
    tpu.vector_store %arg9[%c0_11, %c0_12], %13 {strides = array<i32>} : memref<8x32xf32, #tpu.memory_space<vmem>>, vector<8x32xf32>,
    %c0_i32_13 = arith.constant 0 : i32
    %15 = arith.cmpi eq, %arg3, %c0_i32_13 : i32
    %16 = arith.extui %15 : i1 to i32
    %c0_i32_14 = arith.constant 0 : i32
    %17 = arith.cmpi ne, %16, %c0_i32_14 : i32
    scf.if %17 {
      %c0_15 = arith.constant 0 : index
      %c0_16 = arith.constant 0 : index
      %18 = vector.load %arg9[%c0_15, %c0_16] : memref<8x32xf32, #tpu.memory_space<vmem>>, vector<8x32xf32>
      %c0_17 = arith.constant 0 : index
      %c0_18 = arith.constant 0 : index
      %c0_19 = arith.constant 0 : index
      %19 = vector.load %arg7[%c0_17, %c0_18, %c0_19] : memref<1x1x32xf32, #tpu.memory_space<vmem>>, vector<1x1x32xf32>
      %20 = vector.shape_cast %19 : vector<1x1x32xf32> to vector<1x32xf32>
      %21 = vector.broadcast %20 : vector<1x32xf32> to vector<8x32xf32>
      %22 = arith.addf %18, %21 : vector<8x32xf32>
      %c0_20 = arith.constant 0 : index
      %c0_21 = arith.constant 0 : index
      %c0_22 = arith.constant 0 : index
      %23 = vector.load %arg8[%c0_20, %c0_21, %c0_22] : memref<1x8x32xf32, #tpu.memory_space<vmem>>, vector<1x8x32xf32>
      %24 = vector.shape_cast %23 : vector<1x8x32xf32> to vector<8x32xf32>
      %25 = vector.shape_cast %22 : vector<8x32xf32> to vector<1x8x32xf32>
      tpu.vector_store %arg8[%c0_20, %c0_21, %c0_22], %25 {strides = array<i32>} : memref<1x8x32xf32, #tpu.memory_space<vmem>>, vector<1x8x32xf32>,
    } else {
    }
    return
  }
  func.func @transform_0(%arg0: i32, %arg1: i32, %arg2: i32, %arg3: i32) -> (i32, i32, i32) {
    %c0_i32 = arith.constant 0 : i32
    return %arg0, %arg1, %arg3 : i32, i32, i32
  }
  func.func @transform_1(%arg0: i32, %arg1: i32, %arg2: i32, %arg3: i32) -> (i32, i32, i32) {
    %c0_i32 = arith.constant 0 : i32
    return %arg0, %arg3, %arg2 : i32, i32, i32
  }
  func.func @transform_2(%arg0: i32, %arg1: i32, %arg2: i32, %arg3: i32) -> (i32, i32, i32) {
    %c0_i32 = arith.constant 0 : i32
    return %arg0, %arg3, %arg2 : i32, i32, i32
  }
  func.func @transform_3(%arg0: i32, %arg1: i32, %arg2: i32, %arg3: i32) -> (i32, i32, i32) {
    %c0_i32 = arith.constant 0 : i32
    %c0_i32_0 = arith.constant 0 : i32
    return %arg0, %c0_i32, %arg2 : i32, i32, i32
  }
  func.func @transform_4(%arg0: i32, %arg1: i32, %arg2: i32, %arg3: i32) -> (i32, i32, i32) {
    %c0_i32 = arith.constant 0 : i32
    return %arg0, %arg1, %arg2 : i32, i32, i32
  }
}

</mosaic_0001>

<bundles_post_ra>
// kernel: tpu_custom_call.1
= control target key start
LH: loop header
LB: loop body
LE: loop exit
PB: predicated region body
PF: predicated region fallthrough
CT: control target
= control target key end

     0   :  { %s1240_s0 = inlined_call_operand.hbm [shape: f32[3,8,32], index: 0, kind: input, shape index: {}]   ;;  %s1241_s1 = inlined_call_operand.hbm [shape: f32[3,32,32], index: 1, kind: input, shape index: {}]   ;;  %s1242_s2 = inlined_call_operand.hbm [shape: s8[3,32,32], index: 2, kind: input, shape index: {}]   ;;  %s1243_s3 = inlined_call_operand.vmem [shape: f32[3,1,32], index: 3, kind: input, shape index: {}]   ;;  %s1244_s4 = inlined_call_operand.hbm [shape: f32[3,8,32], index: 4, kind: output, shape index: {}]  }
   0x1   :  { %1252 = sst [smem:[#allocation17_spill]] %s1241_s1 }
   0x2   :  { %9 = vsyncpa [#allocation4], 0 }
   0x3   :  { %11 = vsyncpa [#allocation4 + $0x1], 0 }
   0x4   :  { %12 = vsyncpa [#allocation7], 0 }
   0x5   :  { %14 = vsyncpa [#allocation7 + $0x1], 0 }
   0x6   :  { %15 = vsyncpa [#allocation5], 0 }
   0x7   :  { %17 = vsyncpa [#allocation5 + $0x1], 0  ;;  %s975_s15 = smov 0   ;;  %s977_s16 = smov 0  }
   0x8   :  { %s979_s17 = smov 0   ;;  %s981_s18 = smov 0  }
   0x9   :  { %s983_s19 = smov 0   ;;  %s985_s20 = smov 0  }
   0xa LB: > { %1253 = sst [smem:[#allocation13_spill]] %s927_s17  ;;  %s1006_s21 = sadd.s32 4294967295, %s939_s20   ;;  %s939_s20 = sphi %s985_s20, %s23_s20   ;;  %s935_s19 = sphi %s983_s19, %s1274_s19   ;;  %s931_s18 = sphi %s981_s18, %s1273_s18   ;;  %s927_s17 = sphi %s979_s17, %s1272_s17   ;;  %s923_s16 = sphi %s977_s16, %s1276_s16   ;;  %s919_s15 = sphi %s975_s15, %s1275_s15  }
   0xb   : > { %1254 = sst [smem:[#allocation14_spill]] %s935_s19  ;;  %s642_s22 = sadd.s32 4294967294, %s939_s20  }
   0xc   : > { %s49_s23 = sadd.s32 1, %s935_s19  ;;  %s60_s24 = sadd.s32 1, %s927_s17 }
   0xd   : > { %p51_p0 = scmp.ge.s32.totalorder %s49_s23, 3  ;;  %p67_p1 = scmp.ne.s32.totalorder %s927_s17, %s923_s16 }
   0xe   : > { %p68_p2 = scmp.eq.s32.totalorder %s939_s20, 0  ;;  %p73_p3 = scmp.ne.s32.totalorder %s923_s16, %s919_s15 }
   0xf   : > { %s1278_s23 = smov (%p51_p0, %s49_s23), 0  ;;  %p74_p5 = scmp.eq.s32.totalorder %s1006_s21, 0 }
  0x10   : > { %1255 = sst [smem:[#allocation15_spill]] %s1278_s23  ;;  %p1018_p4 = por %p68_p2, %p67_p1 }
  0x11   : > { %s53_s26 = ssub.s32 %s935_s19, %s1278_s23  ;;  %p189_p6 = scmp.eq.s32.totalorder %s1006_s21, 2 }
  0x12   : > { %p58_p7 = scmp.eq.s32.totalorder %s53_s26, 0  ;;  %p1026_p8 = por %p74_p5, %p73_p3 }
  0x13   : > { %p1030_p9 = por %p189_p6, %p67_p1  ;;  %p195_p10 = scmp.eq.s32.totalorder %s642_s22, 2 }
  0x14   : > { %s1257_s27 = scalar_select %p1026_p8, 1, 0 }
  0x15   : > { %s1258_s28 = scalar_select %p1030_p9, 1, 0 }
  0x16   : > { %s1035_s29 = scalar_select %p58_p7, %s927_s17, %s60_s24  }
  0x17   : > { %p1037_p11 = por %p195_p10, %p73_p3  ;;  %p708_p12 = scmp.lt.s32.totalorder %s939_s20, 3 }
  0x18   : > { %1259 = sst [smem:[#allocation16_spill]] %s1035_s29  ;;  %s1043_s5 = sand.u32 1, %s927_s17  }
  0x19   : > { %s1260_s30 = scalar_select %p1037_p11, 1, 0 }
  0x1a   : > { %s235_s6 = sand.u32 1, %s939_s20   ;;  %s647_s7 = sshll.u32 %s1043_s5, 5 }
  0x1b   : > { %p1049_p13 = pnand %p708_p12, %p1018_p4  ;;  %s663_s9 = sshll.u32 %s935_s19, 9 }
  0x1c   : > { %s1262_s1 = sld [smem:[#allocation17_spill]]  ;;  %s239_s13 = scalar_lea.vmem [#allocation6], %s647_s7 }
  0x1d   : > { %s1261_s8 = scalar_select %p1049_p13, 1, 0 }
  0x1e   : > { %s249_s14 = sshll.u32 %s239_s13, 4  ;;  %s1061_s22 = scalar_lea.sflag [#allocation7], %s235_s6  ;;  %s1059_s14 = int_to_ptr.vmem [resolvable:$true] %s249_s14 }
  0x1f   : > { %p1067_p1 = pneg %p1049_p13 }
  0x22   : > { %s1057_s12 = scalar_lea.hbm %s1262_s1, %s663_s9  ;;  %s768_s7 = scalar_lea.hbm %s1262_s1, 1536 }
  0x23   : > { %s763_s24 = scalar_lea.hbm %s1057_s12, 512  ;;  %p769_p4 = scmp.lt.u32.totalorder %s1057_s12, %s1262_s1 }
  0x24   : > { %p764_p0 = scmp.ne.s32.totalorder %s1057_s12, %s763_s24  ;;  %p770_p5 = scmp.lt.u32.totalorder %s768_s7, %s763_s24 }
  0x25   : > { %p772_p7 = scmp.lt.u32.totalorder %s763_s24, %s1057_s12 }
  0x26   : > { %p766_p2 = pnand %p1067_p1, %p764_p0  ;;  %p771_p6 = por %p770_p5, %p769_p4 }
  0x28   : > { %p767_p3 = pneg %p766_p2  ;;  %p773_p10 = por %p772_p7, %p771_p6 }
  0x2a   : > { %p774_p12 = pnand %p773_p10, %p767_p3 }
  0x2c   : > { %777 = shalt.err (!%p774_p12)
}
  0x2d   : > { %s778_s6 = scalar_lea.vmem %s1059_s14, 512  ;;  %s941_s13 = smov [#allocation6]  }
  0x2e   : > { %p779_p0 = scmp.ne.s32.totalorder %s1059_s14, %s778_s6  ;;  %s783_s26 = sshll.u32 %s941_s13, 4  ;;  %s784_s26 = int_to_ptr.vmem [resolvable:$false] %s783_s26 }
  0x2f   : > { %s785_s9 = scalar_lea.vmem %s784_s26, 1024  ;;  %p786_p9 = scmp.lt.s32.totalorder %s1059_s14, %s784_s26 }
  0x30   : > { %p781_p2 = pnand %p779_p0, %p1067_p1  ;;  %p787_p8 = scmp.lt.s32.totalorder %s785_s9, %s778_s6 }
  0x32   : > { %p782_p11 = pneg %p781_p2  ;;  %p788_p4 = por %p787_p8, %p786_p9 }
  0x34   : > { %p789_p5 = pnand %p788_p4, %p782_p11 }
  0x36   : > { %792 = shalt.err (!%p789_p5)
}
  0x37   : > { %s942_s24 = smov 128   ;;  %s943_s7 = smov 8  }
  0x38   : > { %700 = dma.hbm_to_vmem [thread:$0]  (!%p1049_p13), %s1057_s12, 512, %s1059_s14, %s1061_s22, %s942_s24, %s942_s24, %s943_s7  }
  0x39   : > { %p652_p3 = scmp.ge.s32.totalorder %s939_s20, 1  ;;  %p286_p6 = scmp.lt.s32.totalorder %s939_s20, 4 }
  0x3a   : > { %s1250_s11 = sshll.u32 %s1043_s5, 3  ;;  %s646_s6 = sshll.u32 %s935_s19, 7 }
  0x3b   : > { %p1093_p8 = pnand %p652_p3, %p286_p6  ;;  %s1102_s9 = scalar_lea.hbm %s1240_s0, %s646_s6 }
  0x3c   : > { %s219_s1 = scalar_lea.vmem [#allocation3], %s1250_s11  ;;  %s1111_s7 = scalar_lea.hbm %s1242_s2, %s646_s6 }
  0x3d   : > { %s1264_s10 = scalar_select %p1093_p8, 1, 0 }
  0x3e   : > { %s228_s12 = sshll.u32 %s219_s1, 4  ;;  %s216_s23 = scalar_lea.sflag [#allocation4], %s1043_s5  ;;  %s1106_s12 = int_to_ptr.vmem [resolvable:$true] %s228_s12 }
  0x3f   : > { %s793_s19 = scalar_lea.hbm %s1102_s9, 128  ;;  %s798_s29 = scalar_lea.hbm %s1240_s0, 384 }
  0x40   : > { %p794_p9 = scmp.ne.s32.totalorder %s1102_s9, %s793_s19  ;;  %p799_p10 = scmp.lt.u32.totalorder %s1102_s9, %s1240_s0 }
  0x41   : > { %p800_p12 = scmp.lt.u32.totalorder %s798_s29, %s793_s19  ;;  %p802_p2 = scmp.lt.u32.totalorder %s793_s19, %s1102_s9 }
  0x42   : > { %p796_p11 = pnand %p794_p9, %p1067_p1 }
  0x43   : > { %p801_p0 = por %p800_p12, %p799_p10 }
  0x44   : > { %p797_p7 = pneg %p796_p11 }
  0x45   : > { %p803_p4 = por %p802_p2, %p801_p0 }
  0x47   : > { %p804_p5 = pnand %p803_p4, %p797_p7 }
  0x49   : > { %807 = shalt.err (!%p804_p5)
}
  0x4a   : > { %s808_s1 = scalar_lea.vmem %s1106_s12, 128  ;;  %s944_s6 = smov [#allocation3]  }
  0x4b   : > { %p809_p3 = scmp.ne.s32.totalorder %s1106_s12, %s808_s1  ;;  %s813_s14 = sshll.u32 %s944_s6, 4  ;;  %s814_s14 = int_to_ptr.vmem [resolvable:$false] %s813_s14 }
  0x4c   : > { %s815_s17 = scalar_lea.vmem %s814_s14, 256  ;;  %p816_p11 = scmp.lt.s32.totalorder %s1106_s12, %s814_s14 }
  0x4d   : > { %p811_p6 = pnand %p809_p3, %p1067_p1  ;;  %p817_p8 = scmp.lt.s32.totalorder %s815_s17, %s808_s1 }
  0x4f   : > { %p812_p9 = pneg %p811_p6  ;;  %p818_p10 = por %p817_p8, %p816_p11 }
  0x51   : > { %p819_p12 = pnand %p818_p10, %p812_p9 }
  0x53   : > { %822 = shalt.err (!%p819_p12)
}
  0x54   : > { %697 = dma.hbm_to_vmem [thread:$0]  (!%p1049_p13), %s1102_s9, 128, %s1106_s12, %s216_s23  }
  0x55   : > { %s1265_s19 = sshll.u32 %s1043_s5, 3  ;;  %s823_s24 = scalar_lea.hbm %s1111_s7, 128 }
  0x56   : > { %s263_s29 = scalar_lea.vmem [#allocation8], %s1265_s19  ;;  %p824_p7 = scmp.ne.s32.totalorder %s1111_s7, %s823_s24 }
  0x57   : > { %s272_s11 = sshll.u32 %s263_s29, 4  ;;  %s828_s1 = scalar_lea.hbm %s1242_s2, 384  ;;  %s273_s11 = int_to_ptr.vmem [resolvable:$true] %s272_s11 }
  0x58   : > { %p826_p8 = pnand %p824_p7, %p1067_p1  ;;  %p829_p2 = scmp.lt.u32.totalorder %s1111_s7, %s1242_s2 }
  0x59   : > { %p830_p4 = scmp.lt.u32.totalorder %s828_s1, %s823_s24  ;;  %p832_p3 = scmp.lt.u32.totalorder %s823_s24, %s1111_s7 }
  0x5a   : > { %p827_p0 = pneg %p826_p8 }
  0x5b   : > { %p831_p5 = por %p830_p4, %p829_p2 }
  0x5d   : > { %p833_p6 = por %p832_p3, %p831_p5 }
  0x5f   : > { %p834_p9 = pnand %p833_p6, %p827_p0 }
  0x61   : > { %837 = shalt.err (!%p834_p9)
}
  0x62   : > { %s838_s23 = scalar_lea.vmem %s273_s11, 128  ;;  %s945_s5 = smov [#allocation8]  }
  0x63   : > { %p839_p11 = scmp.ne.s32.totalorder %s273_s11, %s838_s23  ;;  %s843_s9 = sshll.u32 %s945_s5, 4  ;;  %s844_s9 = int_to_ptr.vmem [resolvable:$false] %s843_s9 }
  0x64   : > { %s845_s12 = scalar_lea.vmem %s844_s9, 256  ;;  %p846_p7 = scmp.lt.s32.totalorder %s273_s11, %s844_s9 }
  0x65   : > { %p841_p10 = pnand %p839_p11, %p1067_p1  ;;  %p847_p8 = scmp.lt.s32.totalorder %s845_s12, %s838_s23 }
  0x67   : > { %p842_p12 = pneg %p841_p10  ;;  %p848_p13 = por %p847_p8, %p846_p7 }
  0x69   : > { %p849_p2 = pnand %p848_p13, %p842_p12 }
  0x6b   : > { %852 = shalt.err (!%p849_p2)
}
  0x6c   : > { %p1266_p4 = scmp.ne.s32.totalorder %s1261_s8, 0  ;;  %p1267_p0 = scmp.ne.s32.totalorder %s1264_s10, 0 }
  0x6d   : > { %s1158_s25 = sand.u32 (!%p1267_p0), 1, %s923_s16   ;;  %p1268_p13 = scmp.ne.s32.totalorder (!%p1267_p0), %s1257_s27, 0 }
  0x6e   : > { %703 = dma.hbm_to_vmem [thread:$0]  (!%p1266_p4), %s1111_s7, 128, %s273_s11, %s1061_s22  }
  0x6f   : > { %290 = sbr.rel (%p1267_p0) target bundleno = 377 (0x179), region = 36  ;;  %s1161_s17 = sshll.u32 (!%p1267_p0), %s1158_s25, 3 }
  0x70   : > { %s293_s19 = scalar_lea.sflag (!%p1267_p0), [#allocation4], %s1158_s25  ;;  %s296_s29 = scalar_lea.vmem (!%p1267_p0), [#allocation3], %s1161_s17 }
  0x76   : > { %906 = dma.done.wait (%p1268_p13), %s293_s19, 128  }
  0x77   : > { %908 = vsyncadd (%p1268_p13), %s293_s19, 4294967168  ;;  %s301_s8 = sand.u32 1, %s1006_s21   ;;  %s654_s22 = sshll.u32 %s1158_s25, 5 }
  0x78   : > { %s302_s10 = scalar_lea.sflag [#allocation7], %s301_s8  ;;  %s305_s7 = scalar_lea.vmem [#allocation6], %s654_s22 }
  0x79   : > { %910 = dma.done.wait (%p1268_p13), %s302_s10, 640  }
  0x7a   : > { %912 = vsyncadd (%p1268_p13), %s302_s10, 4294966656  ;;  %vm366_vm0 = vcmask 261120   ;;  %v946_v0 = vmov 0.0|0.0   ;;  %v947_v1 = vmov 0.0   ;;  %vm948_vm1 = vmmov 0   ;;  %s314_s11 = scalar_lea.vmem [#allocation8], %s1161_s17 }
  0x7b   : > { %680 = vmatprep.subr.bf16.mxu0 %v946_v0  ;;  %367 = vst.msk [vmem:[#allocation2] sm:$0xff] %vm366_vm0, %v947_v1  ;;  %677 = vmatprep.mubr.msk.f32.mxu0 %vm948_vm1, %v947_v1  ;;  %v373_v2 = vld [vmem:[%s314_s11] sm:$0xff]  ;;  %v371_v9 = vld [vmem:[%s305_s7 + $0x10] sm:$0xff]  ;;  %v372_v10 = vld [vmem:[%s305_s7 + $0x18] sm:$0xff]  ;;  %p356_p1 = scmp.lt.s32.totalorder %s931_s18, 2  ;;  %s660_s26 = sshll.u32 %s931_s18, 7 }
  0x7c   : > { %v369_v3 = vld [vmem:[%s305_s7] sm:$0xff]  ;;  %v374_v4 = vunpack.c.0.s8 %v373_v2  ;;  %v375_v5 = vunpack.c.1.s8 %v373_v2  ;;  %v376_v6 = vunpack.c.2.s8 %v373_v2  ;;  %v377_v7 = vunpack.c.3.s8 %v373_v2  ;;  %v370_v8 = vld [vmem:[%s305_s7 + $0x8] sm:$0xff]  ;;  %v368_v21 = vld [vmem:[%s296_s29] sm:$0xff]  ;;  %s354_s1 = scalar_lea.vmem [#allocation9], %s1161_s17  ;;  %s1191_s5 = scalar_lea.hbm %s1244_s4, %s660_s26 }
  0x7d   : > { %s357_s21 = scalar_select %p356_p1, %s931_s18, 2 }
  0x7e   : > { %v378_v11 = vcvt.s32.f32 %v374_v4  ;;  %v379_v12 = vcvt.s32.f32 %v375_v5  ;;  %v380_v13 = vcvt.s32.f32 %v376_v6  ;;  %v381_v14 = vcvt.s32.f32 %v377_v7  ;;  %s492_s6 = sshll.u32 %s354_s1, 4  ;;  %s477_s9 = scalar_lea.sflag [#allocation5], %s1158_s25  ;;  %s1193_s6 = int_to_ptr.vmem [resolvable:$true] %s492_s6 }
  0x7f   : > { %s361_s13 = scalar_lea.vmem %s1243_s3, %s357_s21  ;;  %s853_s12 = scalar_lea.vmem %s1193_s6, 128 }
  0x80   : > { %v382_v15 = vmul.f32 %v378_v11, %v369_v3  ;;  %v383_v16 = vmul.f32 %v379_v12, %v370_v8  ;;  %v384_v17 = vmul.f32 %v380_v13, %v371_v9  ;;  %v385_v18 = vmul.f32 %v381_v14, %v372_v10  ;;  %v658_v26 = vld [vmem:[%s361_s13] ss:$0 sm:$0xff]  ;;  %p854_p5 = scmp.ne.s32.totalorder %s1193_s6, %s853_s12  ;;  %p1269_p3 = scmp.ne.s32.totalorder %s1258_s28, 0 }
  0x81   : > { %s949_s18 = smov [#allocation9]  }
  0x82   : > { %v681_v19 = vpack.c.bf16 %v383_v16, %v382_v15  ;;  %v684_v20 = vpack.c.bf16 %v385_v18, %v384_v17  ;;  %v386_v22 = vld [vmem:[#allocation2] sm:$0xff]  ;;  %p855_p6 = pnand %p854_p5, %p1269_p3  ;;  %s857_s17 = sshll.u32 %s949_s18, 4  ;;  %s858_s17 = int_to_ptr.vmem [resolvable:$false] %s857_s17 }
  0x83   : > { %s859_s19 = scalar_lea.vmem %s858_s17, 256  ;;  %p860_p11 = scmp.lt.s32.totalorder %s1193_s6, %s858_s17 }
  0x84   : > { %682 = vmatpush3.bf16.msra.mxu0 %v681_v19  ;;  %p856_p9 = pneg %p855_p6  ;;  %p861_p10 = scmp.lt.s32.totalorder %s859_s19, %s853_s12 }
  0x85   : > { %683 = vmatprep.subr.bf16.mxu0 %v946_v0 }
  0x86   : > { %p862_p12 = por %p861_p10, %p860_p11 }
  0x88   : > { %685 = vmatpush3.bf16.msra.mxu0 %v684_v20  ;;  %p863_p7 = pnand %p862_p12, %p856_p9 }
  0x8b   : > { %678 = vmatmul.mubr.msk.f32.vlgmr.msra.gmra.mrb[0].mxu0 %vm366_vm0, %v368_v21 }
 0x15e   : > { %v457_v23 = vpop.f32.mrb[0].mxu0 }
 0x15f   : > { %v461_v24 = vadd.f32 %v457_v23, %v386_v22  ;;  %v679_v25 = vpop.f32.mrb[1].mxu0 }
 0x161   : > { %462 = vst.msk [vmem:[#allocation2] sm:$0xff] %vm366_vm0, %v461_v24 }
 0x168   : > { %v466_v27 = vld [vmem:[#allocation2] sm:$0xff] }
 0x169   : > { %v474_v28 = vadd.f32 %v658_v26, %v466_v27 }
 0x16b   : > { %475 = vst.msk [vmem:[%s354_s1] sm:$0xff] %vm366_vm0, %v474_v28 }
 0x16c   : > { %866 = shalt.err (!%p863_p7)
}
 0x16d   : > { %s867_s25 = scalar_lea.hbm %s1191_s5, 128  ;;  %s871_s22 = scalar_lea.hbm %s1244_s4, 384 }
 0x16e   : > { %p868_p8 = scmp.ne.s32.totalorder %s1191_s5, %s867_s25  ;;  %p872_p0 = scmp.lt.u32.totalorder %s1191_s5, %s1244_s4 }
 0x16f   : > { %p873_p13 = scmp.lt.u32.totalorder %s871_s22, %s867_s25  ;;  %p875_p5 = scmp.lt.u32.totalorder %s867_s25, %s1191_s5 }
 0x170   : > { %p869_p2 = pnand %p868_p8, %p1269_p3 }
 0x171   : > { %p874_p1 = por %p873_p13, %p872_p0 }
 0x172   : > { %p870_p4 = pneg %p869_p2 }
 0x173   : > { %p876_p6 = por %p875_p5, %p874_p1 }
 0x175   : > { %p877_p9 = pnand %p876_p6, %p870_p4 }
 0x177   : > { %880 = shalt.err (!%p877_p9)
}
 0x178   : > { %692 = dma.vmem_to_hbm [thread:$0]  (%p1269_p3), %s1193_s6, 128, %s1191_s5, %s477_s9  }
 0x179 PF: > { %p709_p11 = scmp.ge.s32.totalorder %s939_s20, 2  ;;  %s504_s11 = sand.u32 1, %s919_s15  }
 0x17a   : > { %p1270_p10 = scmp.ne.s32.totalorder %s1260_s30, 0  ;;  %s505_s21 = scalar_lea.sflag [#allocation5], %s504_s11 }
 0x17c   : > { %p705_p12 = pnand %p709_p11, %p1270_p10 }
 0x17e   : > { %914 = dma.done.wait (!%p705_p12), %s505_s21, 128  }
 0x17f   : > { %916 = vsyncadd (!%p705_p12), %s505_s21, 4294967168  ;;  %s23_s20 = sadd.s32 1, %s939_s20   ;;  %s1271_s27 = sld [smem:[#allocation13_spill]] }
 0x180   : > { %p20_p7 = scmp.ge.s32.totalorder %s23_s20, 5   ;;  %s1272_s17 = sld [smem:[#allocation16_spill]] }
 0x181   : > { %s1273_s18 = sld [smem:[#allocation14_spill]]  ;;  %s1274_s19 = sld [smem:[#allocation15_spill]] }
 0x182   : > { %s1275_s15 = smov %s923_s16  ;;  %22 = sbr.rel (!%p20_p7) target bundleno = 10 (0xa), region = 116 }
 0x185   : > { %s1276_s16 = smov %s1271_s27 }
 0x189   :  { %510 = vsyncpa [#allocation4], 1 }
 0x18a   :  { %512 = vsyncpa [#allocation4 + $0x1], 1 }
 0x18b   :  { %513 = vsyncpa [#allocation7], 1 }
 0x18c   :  { %515 = vsyncpa [#allocation7 + $0x1], 1 }
 0x18d   :  { %516 = vsyncpa [#allocation5], 1 }
 0x18e   :  { %518 = vsyncpa [#allocation5 + $0x1], 1 }

</bundles_post_ra>
